<compile_context>
chip_gen: v7x
topology: tpu7x:2x2x1
jax: 0.10.0
libtpu: 0.0.40
codegen_flags: <defaults>
</compile_context>

<pallas_src>
import jax
import jax.numpy as jnp
from jax import lax
from jax.experimental import pallas as pl
from jax.experimental.pallas import tpu as pltpu


def nlds_kernel(x_ref, apow_ref, bc_ref, o_ref, h_carry, s_a, s_b):
    # x_ref   : (tb, T, state)   native-layout input chunk
    # apow_ref: (T, state)       apow[i] = A ** (i + 1)
    # bc_ref  : (state, out)     readout matrix BC
    # o_ref   : (tb, T, out)     output chunk
    # h_carry : (tb, state)      VMEM scratch: recurrent state carried across seq tiles
    # s_a/s_b : (tb, PAD+T, state) VMEM ping-pong scan buffers, first PAD rows kept zero
    tb, T, state = x_ref.shape
    out_dim = o_ref.shape[-1]
    PAD = s_a.shape[1] - T            # zero-filled shift-in rows (>= largest offset, 8-aligned)

    @pl.when(pl.program_id(1) == 0)
    def _():
        # New batch tile: reset the recurrent state and (re)zero the shift-in pad rows.
        # The scan only ever writes rows [PAD:], so the pad stays zero afterwards.
        h_carry[...] = jnp.zeros_like(h_carry)
        s_a[:, :PAD, :] = jnp.zeros((tb, PAD, state), jnp.float32)
        s_b[:, :PAD, :] = jnp.zeros((tb, PAD, state), jnp.float32)

    apow = apow_ref[...].astype(jnp.float32)           # (T, state)

    # ---- in-chunk zero-init scan:  s_i = sum_{j<=i} A^(i-j) x_j ----------------------
    # Hillis-Steele doubling: log2(T) fully parallel VPU rounds.  The shifted operand is
    # read at offset (PAD - off) inside the zero-padded scratch, so rows i < off pick up
    # zeros automatically -- no per-round zero-pad / concatenate copies, no masks, and
    # every store is a full sublane-aligned block store.
    s_a[:, PAD:, :] = x_ref[...].astype(jnp.float32)
    src, dst = s_a, s_b
    p = apow[0:1, :].reshape(1, 1, state)              # A^(2^r) for round r (starts at A^1)
    off = 1
    while off < T:                                      # static Python loop, ceil(log2(T)) rounds
        dst[:, PAD:, :] = src[:, PAD:, :] + p * src[:, PAD - off: PAD - off + T, :]
        src, dst = dst, src
        off *= 2
        if off < T:
            p = p * p
    s = src[:, PAD:, :]                                 # (tb, T, state) final in-chunk scan

    # ---- cross-chunk carry:  h_i = s_i + A^(i+1) * h_prev ----------------------------
    # Select away the carry term on the first seq tile (avoids 0*inf -> NaN when
    # A^(i+1) overflows f32 for |A| > 1; jnp.where does not propagate the unselected NaN).
    carry_term = apow[None, :, :] * h_carry[...][:, None, :]
    h = jnp.where(pl.program_id(1) == 0, s, s + carry_term)
    h_carry[...] = h[:, T - 1, :]                       # carry into the next seq tile

    # ---- hoisted readout: one MXU matmul + one full-block store per chunk ------------
    y = jnp.dot(h.reshape(tb * T, state), bc_ref[...].astype(jnp.float32),
                preferred_element_type=jnp.float32)
    o_ref[...] = y.reshape(tb, T, out_dim).astype(o_ref.dtype)


def nlds_forward(inputs, A, BC, *, seq_chunk=None, batch_tile=128):
    """inputs: (batch, seq, state_dim); A: (state_dim,); BC: (state_dim, output_dim)."""
    batch, seq, state = inputs.shape
    out_dim = BC.shape[1]
    dtype = inputs.dtype
    itemsize = jnp.dtype(dtype).itemsize

    # ---- tile-size selection ---------------------------------------------------------
    if seq_chunk is None:
        seq_chunk = min(128, pl.next_power_of_2(max(seq, 8)))
    seq_chunk = max(8, pl.cdiv(int(seq_chunk), 8) * 8)   # keep time axis 8-row aligned

    batch_p8 = pl.cdiv(batch, 8) * 8
    tb = max(8, (min(int(batch_tile), batch_p8) // 8) * 8)
    # v7x has 2 TensorCores: keep >=2 grid points on the "parallel" batch axis if we can.
    if batch_p8 >= 16 and batch_p8 // tb < 2:
        tb = max(8, ((batch_p8 // 2) // 8) * 8)

    # ---- VMEM budgeting (v7x: 64 MiB/core -> keep the working set <= ~48 MiB) --------
    def vmem_estimate(tb_, tc_):
        in_blk = tb_ * tc_ * state * itemsize
        out_blk = tb_ * tc_ * out_dim * itemsize
        scan = 2 * tb_ * (tc_ + tc_ // 2 + 8) * state * 4     # zero-padded ping-pong bufs
        live = 2 * tb_ * tc_ * max(state, out_dim) * 4        # h / y temporaries
        fixed = (tc_ * state + state * out_dim + tb_ * state) * 4
        return 2 * (in_blk + out_blk) + scan + live + fixed   # 2x: double-buffered blocks

    budget = 48 * 1024 * 1024
    while vmem_estimate(tb, seq_chunk) > budget and (seq_chunk > 8 or tb > 8):
        if seq_chunk >= tb and seq_chunk > 8:
            seq_chunk = max(8, ((seq_chunk // 2) // 8) * 8)
        else:
            tb = max(8, ((tb // 2) // 8) * 8)
    vmem_limit = int(min(64 * 1024 * 1024,
                         max(32 * 1024 * 1024, int(1.25 * vmem_estimate(tb, seq_chunk)))))

    batch_p = pl.cdiv(batch, tb) * tb
    seq_p = pl.cdiv(seq, seq_chunk) * seq_chunk

    # zero-padded shift-in rows for the scan scratch: >= largest Hillis-Steele offset
    off_max = 1
    while off_max * 2 < seq_chunk:
        off_max *= 2
    pad_rows = max(8, pl.cdiv(off_max, 8) * 8)

    # ---- operands (native (batch, seq, state) layout; no wrapper transposes) ---------
    x = inputs
    if batch_p != batch or seq_p != seq:
        x = jnp.pad(x, ((0, batch_p - batch), (0, seq_p - seq), (0, 0)))

    # A^(i+1) for i in [0, seq_chunk): carry-term weights (cumprod -> no pow hazards).
    apow = jnp.cumprod(
        jnp.broadcast_to(A.astype(jnp.float32)[None, :], (seq_chunk, state)), axis=0)

    grid = (batch_p // tb, seq_p // seq_chunk)           # (parallel batch, arbitrary seq)

    out = pl.pallas_call(
        nlds_kernel,
        out_shape=jax.ShapeDtypeStruct((batch_p, seq_p, out_dim), dtype),
        grid_spec=pltpu.PrefetchScalarGridSpec(
            num_scalar_prefetch=0,
            grid=grid,
            in_specs=[
                pl.BlockSpec((tb, seq_chunk, state), lambda i, j: (i, j, 0)),
                pl.BlockSpec((seq_chunk, state), lambda i, j: (0, 0)),
                pl.BlockSpec((state, out_dim), lambda i, j: (0, 0)),
            ],
            out_specs=pl.BlockSpec((tb, seq_chunk, out_dim), lambda i, j: (i, j, 0)),
            scratch_shapes=[
                pltpu.VMEM((tb, state), jnp.float32),                       # h carry
                pltpu.VMEM((tb, pad_rows + seq_chunk, state), jnp.float32),  # scan buf A
                pltpu.VMEM((tb, pad_rows + seq_chunk, state), jnp.float32),  # scan buf B
            ],
        ),
        compiler_params=pltpu.CompilerParams(
            dimension_semantics=("parallel", "arbitrary"),
            vmem_limit_bytes=vmem_limit,
        ),
    )(x, apow, BC)

    return out[:batch, :seq]


def nlds_reference(inputs, A, BC):
    """Pure-JAX reference (lax.scan) mirroring the PyTorch per-timestep loop."""
    def step(h, x_t):
        h = h * A + x_t
        return h, h @ BC
    h0 = jnp.zeros((inputs.shape[0], A.shape[0]), jnp.float32)
    _, ys = lax.scan(step, h0, jnp.swapaxes(inputs, 0, 1))
    return jnp.swapaxes(ys, 0, 1)


if __name__ == "__main__":
    # Small shapes consistent with the module's forward (inputs last dim == state_dim).
    batch, seq = 2, 16
    state_dim, input_dim, output_dim = 32, 32, 32
    dtype = jnp.float32

    key = jax.random.PRNGKey(0)
    k_a, k_bc, k_x = jax.random.split(key, 3)

    # Parameter init mirroring NLDS.__init__ (randn A, randn/state_dim BC); the forward
    # pass only uses A, BC and h0 == 0 (B and C are not used in forward).
    A = jax.random.normal(k_a, (state_dim,), dtype)
    BC = jax.random.normal(k_bc, (state_dim, output_dim), dtype) / state_dim
    x = jax.random.normal(k_x, (batch, seq, state_dim), dtype)

    # seq_chunk=8 -> two seq tiles, exercising the cross-tile carry and the j==0 reset.
    y = nlds_forward(x, A, BC, seq_chunk=8)
    y = jax.block_until_ready(y)

    y_ref = nlds_reference(x, A, BC)
    assert y.shape == (batch, seq, output_dim)
    err = float(jnp.max(jnp.abs(y - y_ref)))
    scale = float(jnp.max(jnp.abs(y_ref)))
    assert err <= 1e-3 * (1.0 + scale), f"mismatch vs reference: err={err}, scale={scale}"

    print("KERNEL_OK")
</pallas_src>

<mosaic_0001>
module attributes {stable_mosaic.version = 11 : i64} {
  func.func @nlds_kernel(%arg0: i32, %arg1: i32, %arg2: memref<8x8x32xf32, #tpu.memory_space<vmem>>, %arg3: memref<8x32xf32, #tpu.memory_space<vmem>>, %arg4: memref<32x32xf32, #tpu.memory_space<vmem>>, %arg5: memref<8x8x32xf32, #tpu.memory_space<vmem>>, %arg6: memref<8x32xf32, #tpu.memory_space<vmem>>, %arg7: memref<8x16x32xf32, #tpu.memory_space<vmem>>, %arg8: memref<8x16x32xf32, #tpu.memory_space<vmem>>) attributes {dimension_semantics = [#tpu.dimension_semantics<parallel>, #tpu.dimension_semantics<arbitrary>], iteration_bounds = array<i64: 1, 2>, scalar_prefetch = 0 : i64, scratch_operands = 3 : i64, tpu.core_type = #tpu.core_type<tc>, window_params = [{transform_indices = @transform_0, window_bounds = array<i64: 8, 8, 32>}, {pipeline_mode = #tpu.pipeline_mode<synchronous>, transform_indices = @transform_1, window_bounds = array<i64: 8, 32>}, {pipeline_mode = #tpu.pipeline_mode<synchronous>, transform_indices = @transform_2, window_bounds = array<i64: 32, 32>}, {transform_indices = @transform_3, window_bounds = array<i64: 8, 8, 32>}]} {
    %c0_i32 = arith.constant 0 : i32
    %0 = arith.cmpi eq, %arg1, %c0_i32 : i32
    %1 = arith.extui %0 : i1 to i32
    %c0_i32_0 = arith.constant 0 : i32
    %2 = arith.cmpi ne, %1, %c0_i32_0 : i32
    scf.if %2 {
      %cst_44 = arith.constant 0.000000e+00 : f32
      %46 = vector.broadcast %cst_44 : f32 to vector<8x32xf32>
      %c0_45 = arith.constant 0 : index
      %c0_46 = arith.constant 0 : index
      %47 = vector.load %arg6[%c0_45, %c0_46] : memref<8x32xf32, #tpu.memory_space<vmem>>, vector<8x32xf32>
      tpu.vector_store %arg6[%c0_45, %c0_46], %46 {strides = array<i32>} : memref<8x32xf32, #tpu.memory_space<vmem>>, vector<8x32xf32>,
      %cst_47 = arith.constant 0.000000e+00 : f32
      %48 = vector.broadcast %cst_47 : f32 to vector<8x8x32xf32>
      %c0_48 = arith.constant 0 : index
      %c0_49 = arith.constant 0 : index
      %c0_50 = arith.constant 0 : index
      %49 = vector.load %arg7[%c0_48, %c0_49, %c0_50] : memref<8x16x32xf32, #tpu.memory_space<vmem>>, vector<8x8x32xf32>
      tpu.vector_store %arg7[%c0_48, %c0_49, %c0_50], %48 {strides = array<i32>} : memref<8x16x32xf32, #tpu.memory_space<vmem>>, vector<8x8x32xf32>,
      %cst_51 = arith.constant 0.000000e+00 : f32
      %50 = vector.broadcast %cst_51 : f32 to vector<8x8x32xf32>
      %c0_52 = arith.constant 0 : index
      %c0_53 = arith.constant 0 : index
      %c0_54 = arith.constant 0 : index
      %51 = vector.load %arg8[%c0_52, %c0_53, %c0_54] : memref<8x16x32xf32, #tpu.memory_space<vmem>>, vector<8x8x32xf32>
      tpu.vector_store %arg8[%c0_52, %c0_53, %c0_54], %50 {strides = array<i32>} : memref<8x16x32xf32, #tpu.memory_space<vmem>>, vector<8x8x32xf32>,
    } else {
    }
    %c0 = arith.constant 0 : index
    %c0_1 = arith.constant 0 : index
    %3 = vector.load %arg3[%c0, %c0_1] : memref<8x32xf32, #tpu.memory_space<vmem>>, vector<8x32xf32>
    %c0_2 = arith.constant 0 : index
    %c0_3 = arith.constant 0 : index
    %c0_4 = arith.constant 0 : index
    %4 = vector.load %arg2[%c0_2, %c0_3, %c0_4] : memref<8x8x32xf32, #tpu.memory_space<vmem>>, vector<8x8x32xf32>
    %c0_5 = arith.constant 0 : index
    %c8 = arith.constant 8 : index
    %c0_6 = arith.constant 0 : index
    %5 = vector.load %arg7[%c0_5, %c8, %c0_6] : memref<8x16x32xf32, #tpu.memory_space<vmem>>, vector<8x8x32xf32>
    tpu.vector_store %arg7[%c0_5, %c8, %c0_6], %4 {strides = array<i32>} : memref<8x16x32xf32, #tpu.memory_space<vmem>>, vector<8x8x32xf32>,
    %6 = vector.extract_strided_slice %3 {offsets = [0, 0], sizes = [1, 32], strides = [1, 1]} : vector<8x32xf32> to vector<1x32xf32>
    %7 = vector.shape_cast %6 : vector<1x32xf32> to vector<1x1x32xf32>
    %c0_7 = arith.constant 0 : index
    %c8_8 = arith.constant 8 : index
    %c0_9 = arith.constant 0 : index
    %8 = vector.load %arg7[%c0_7, %c8_8, %c0_9] : memref<8x16x32xf32, #tpu.memory_space<vmem>>, vector<8x8x32xf32>
    %c0_10 = arith.constant 0 : index
    %c7 = arith.constant 7 : index
    %c0_11 = arith.constant 0 : index
    %9 = vector.load %arg7[%c0_10, %c7, %c0_11] : memref<8x16x32xf32, #tpu.memory_space<vmem>>, vector<8x8x32xf32>
    %10 = vector.broadcast %7 : vector<1x1x32xf32> to vector<8x8x32xf32>
    %11 = arith.mulf %10, %9 : vector<8x8x32xf32>
    %12 = arith.addf %8, %11 : vector<8x8x32xf32>
    %c0_12 = arith.constant 0 : index
    %c8_13 = arith.constant 8 : index
    %c0_14 = arith.constant 0 : index
    %13 = vector.load %arg8[%c0_12, %c8_13, %c0_14] : memref<8x16x32xf32, #tpu.memory_space<vmem>>, vector<8x8x32xf32>
    tpu.vector_store %arg8[%c0_12, %c8_13, %c0_14], %12 {strides = array<i32>} : memref<8x16x32xf32, #tpu.memory_space<vmem>>, vector<8x8x32xf32>,
    %14 = arith.mulf %7, %7 : vector<1x1x32xf32>
    %c0_15 = arith.constant 0 : index
    %c8_16 = arith.constant 8 : index
    %c0_17 = arith.constant 0 : index
    %15 = vector.load %arg8[%c0_15, %c8_16, %c0_17] : memref<8x16x32xf32, #tpu.memory_space<vmem>>, vector<8x8x32xf32>
    %c0_18 = arith.constant 0 : index
    %c6 = arith.constant 6 : index
    %c0_19 = arith.constant 0 : index
    %16 = vector.load %arg8[%c0_18, %c6, %c0_19] : memref<8x16x32xf32, #tpu.memory_space<vmem>>, vector<8x8x32xf32>
    %17 = vector.broadcast %14 : vector<1x1x32xf32> to vector<8x8x32xf32>
    %18 = arith.mulf %17, %16 : vector<8x8x32xf32>
    %19 = arith.addf %15, %18 : vector<8x8x32xf32>
    %c0_20 = arith.constant 0 : index
    %c8_21 = arith.constant 8 : index
    %c0_22 = arith.constant 0 : index
    %20 = vector.load %arg7[%c0_20, %c8_21, %c0_22] : memref<8x16x32xf32, #tpu.memory_space<vmem>>, vector<8x8x32xf32>
    tpu.vector_store %arg7[%c0_20, %c8_21, %c0_22], %19 {strides = array<i32>} : memref<8x16x32xf32, #tpu.memory_space<vmem>>, vector<8x8x32xf32>,
    %21 = arith.mulf %14, %14 : vector<1x1x32xf32>
    %c0_23 = arith.constant 0 : index
    %c8_24 = arith.constant 8 : index
    %c0_25 = arith.constant 0 : index
    %22 = vector.load %arg7[%c0_23, %c8_24, %c0_25] : memref<8x16x32xf32, #tpu.memory_space<vmem>>, vector<8x8x32xf32>
    %c0_26 = arith.constant 0 : index
    %c4 = arith.constant 4 : index
    %c0_27 = arith.constant 0 : index
    %23 = vector.load %arg7[%c0_26, %c4, %c0_27] : memref<8x16x32xf32, #tpu.memory_space<vmem>>, vector<8x8x32xf32>
    %24 = vector.broadcast %21 : vector<1x1x32xf32> to vector<8x8x32xf32>
    %25 = arith.mulf %24, %23 : vector<8x8x32xf32>
    %26 = arith.addf %22, %25 : vector<8x8x32xf32>
    %c0_28 = arith.constant 0 : index
    %c8_29 = arith.constant 8 : index
    %c0_30 = arith.constant 0 : index
    %27 = vector.load %arg8[%c0_28, %c8_29, %c0_30] : memref<8x16x32xf32, #tpu.memory_space<vmem>>, vector<8x8x32xf32>
    tpu.vector_store %arg8[%c0_28, %c8_29, %c0_30], %26 {strides = array<i32>} : memref<8x16x32xf32, #tpu.memory_space<vmem>>, vector<8x8x32xf32>,
    %c0_31 = arith.constant 0 : index
    %c8_32 = arith.constant 8 : index
    %c0_33 = arith.constant 0 : index
    %28 = vector.load %arg8[%c0_31, %c8_32, %c0_33] : memref<8x16x32xf32, #tpu.memory_space<vmem>>, vector<8x8x32xf32>
    %29 = vector.shape_cast %3 : vector<8x32xf32> to vector<1x8x32xf32>
    %c0_34 = arith.constant 0 : index
    %c0_35 = arith.constant 0 : index
    %30 = vector.load %arg6[%c0_34, %c0_35] : memref<8x32xf32, #tpu.memory_space<vmem>>, vector<8x32xf32>
    %31 = vector.shape_cast %30 : vector<8x32xf32> to vector<8x1x32xf32>
    %32 = vector.broadcast %29 : vector<1x8x32xf32> to vector<8x8x32xf32>
    %33 = vector.broadcast %31 : vector<8x1x32xf32> to vector<8x8x32xf32>
    %34 = arith.mulf %32, %33 : vector<8x8x32xf32>
    %c0_i32_36 = arith.constant 0 : i32
    %35 = arith.cmpi eq, %arg1, %c0_i32_36 : i32
    %36 = arith.addf %28, %34 : vector<8x8x32xf32>
    %37 = arith.select %35, %28, %36 : vector<8x8x32xf32>
    %38 = vector.extract_strided_slice %37 {offsets = [0, 7, 0], sizes = [8, 1, 32], strides = [1, 1, 1]} : vector<8x8x32xf32> to vector<8x1x32xf32>
    %39 = vector.shape_cast %38 : vector<8x1x32xf32> to vector<8x32xf32>
    %c0_37 = arith.constant 0 : index
    %c0_38 = arith.constant 0 : index
    %40 = vector.load %arg6[%c0_37, %c0_38] : memref<8x32xf32, #tpu.memory_space<vmem>>, vector<8x32xf32>
    tpu.vector_store %arg6[%c0_37, %c0_38], %39 {strides = array<i32>} : memref<8x32xf32, #tpu.memory_space<vmem>>, vector<8x32xf32>,
    %41 = vector.shape_cast %37 : vector<8x8x32xf32> to vector<64x32xf32>
    %c0_39 = arith.constant 0 : index
    %c0_40 = arith.constant 0 : index
    %42 = vector.load %arg4[%c0_39, %c0_40] : memref<32x32xf32, #tpu.memory_space<vmem>>, vector<32x32xf32>
    %cst = arith.constant dense<0.000000e+00> : vector<64x32xf32>
    %43 = tpu.matmul %41, %42, %cst {dimension_numbers = #tpu.dot_dimension_numbers<[1], [0], [0], [1], [0, 0, 1, 1], [], []>} : vector<64x32xf32>, vector<32x32xf32>, vector<64x32xf32> -> vector<64x32xf32>
    %44 = vector.shape_cast %43 : vector<64x32xf32> to vector<8x8x32xf32>
    %c0_41 = arith.constant 0 : index
    %c0_42 = arith.constant 0 : index
    %c0_43 = arith.constant 0 : index
    %45 = vector.load %arg5[%c0_41, %c0_42, %c0_43] : memref<8x8x32xf32, #tpu.memory_space<vmem>>, vector<8x8x32xf32>
    tpu.vector_store %arg5[%c0_41, %c0_42, %c0_43], %44 {strides = array<i32>} : memref<8x8x32xf32, #tpu.memory_space<vmem>>, vector<8x8x32xf32>,
    return
  }
  func.func @transform_0(%arg0: i32, %arg1: i32) -> (i32, i32, i32) {
    %c0_i32 = arith.constant 0 : i32
    %c0_i32_0 = arith.constant 0 : i32
    return %arg0, %arg1, %c0_i32 : i32, i32, i32
  }
  func.func @transform_1(%arg0: i32, %arg1: i32) -> (i32, i32) {
    %c0_i32 = arith.constant 0 : i32
    %c0_i32_0 = arith.constant 0 : i32
    %c0_i32_1 = arith.constant 0 : i32
    return %c0_i32, %c0_i32_0 : i32, i32
  }
  func.func @transform_2(%arg0: i32, %arg1: i32) -> (i32, i32) {
    %c0_i32 = arith.constant 0 : i32
    %c0_i32_0 = arith.constant 0 : i32
    %c0_i32_1 = arith.constant 0 : i32
    return %c0_i32, %c0_i32_0 : i32, i32
  }
  func.func @transform_3(%arg0: i32, %arg1: i32) -> (i32, i32, i32) {
    %c0_i32 = arith.constant 0 : i32
    %c0_i32_0 = arith.constant 0 : i32
    return %arg0, %arg1, %c0_i32 : i32, i32, i32
  }
}

</mosaic_0001>

<bundles_post_ra>
// kernel: tpu_custom_call.1
= control target key start
LH: loop header
LB: loop body
LE: loop exit
PB: predicated region body
PF: predicated region fallthrough
CT: control target
= control target key end

     0   :  { %8 = vsyncpa [#allocation6], 0  ;;  %s1592_s0 = inlined_call_operand.hbm [shape: f32[8,16,32], index: 0, kind: input, shape index: {}]   ;;  %s1593_s1 = inlined_call_operand.hbm [shape: f32[8,32], index: 1, kind: input, shape index: {}]   ;;  %s1594_s2 = inlined_call_operand.hbm [shape: f32[32,32], index: 2, kind: input, shape index: {}]   ;;  %s1595_s3 = inlined_call_operand.hbm [shape: f32[8,16,32], index: 3, kind: output, shape index: {}]  }
   0x1   :  { %10 = vsyncpa [#allocation6 + $0x1], 0 }
   0x2   :  { %11 = vsyncpa [#allocation9], 0 }
   0x3   :  { %12 = vsyncpa [#allocation7], 0 }
   0x4   :  { %14 = vsyncpa [#allocation7 + $0x1], 0  ;;  %s1190_s12 = smov 0   ;;  %s1192_s13 = smov 0  }
   0x5   :  { %s1194_s14 = smov 0   ;;  %s1196_s15 = smov 0  }
   0x6   :  { %s1198_s16 = smov 0   ;;  %s1200_s17 = smov 0  }
   0x7 LB: > { %s822_s18 = sadd.s32 4294967295, %s1156_s17   ;;  %s823_s19 = sadd.s32 4294967294, %s1156_s17   ;;  %s1156_s17 = sphi %s1200_s17, %s20_s17   ;;  %s1152_s16 = sphi %s1198_s16, %s1625_s16   ;;  %s1148_s15 = sphi %s1196_s15, %s1624_s15   ;;  %s1144_s14 = sphi %s1194_s14, %s1623_s14   ;;  %s1140_s13 = sphi %s1192_s13, %s1622_s13   ;;  %s1136_s12 = sphi %s1190_s12, %s1621_s12  }
   0x8   : > { %p48_p0 = scmp.ne.s32.totalorder %s1144_s14, %s1140_s13  ;;  %p49_p1 = scmp.eq.s32.totalorder %s1156_s17, 0 }
   0x9   : > { %p54_p2 = scmp.ne.s32.totalorder %s1140_s13, %s1136_s12  ;;  %p1228_p3 = scmp.eq.s32.totalorder %s822_s18, 0 }
   0xa   : > { %p122_p4 = scmp.eq.s32.totalorder %s822_s18, 1  ;;  %p1232_p5 = por %p49_p1, %p48_p0 }
   0xb   : > { %s1602_s21 = scalar_select %p1228_p3, 1, 0 }
   0xc   : > { %p128_p6 = scmp.eq.s32.totalorder %s823_s19, 1  ;;  %p1238_p7 = por %p1228_p3, %p54_p2 }
   0xd   : > { %p1242_p8 = por %p122_p4, %p48_p0  ;;  %p824_p10 = scmp.ge.s32.totalorder %s1156_s17, 1 }
   0xe   : > { %s1604_s23 = scalar_select %p1238_p7, 1, 0 }
   0xf   : > { %s1605_s24 = scalar_select %p1242_p8, 1, 0 }
  0x10   : > { %p1246_p9 = por %p128_p6, %p54_p2  ;;  %p135_p11 = scmp.lt.s32.totalorder %s1156_s17, 3 }
  0x11   : > { %s1158_s27 = smov [#allocation8]   ;;  %p921_p1 = scmp.lt.s32.totalorder %s1156_s17, 2 }
  0x12   : > { %s1606_s25 = scalar_select %p1246_p9, 1, 0 }
  0x13   : > { %p1253_p13 = pnand %p824_p10, %p135_p11  ;;  %s148_s28 = sshll.u32 %s1158_s27, 4  ;;  %s149_s28 = int_to_ptr.vmem [resolvable:$true] %s148_s28 }
  0x14   : > { %p1262_p4 = pnand %p921_p1, %p1232_p5  ;;  %s1159_s30 = smov [#allocation10]  }
  0x15   : > { %s1607_s26 = scalar_select %p1253_p13, 1, 0 }
  0x16   : > { %p904_p0 = pneg %p1253_p13  ;;  %s158_s4 = sshll.u32 %s1159_s30, 4  ;;  %s1272_s4 = int_to_ptr.vmem [resolvable:$true] %s158_s4 }
  0x17   : > { %s1608_s29 = scalar_select %p1262_p4, 1, 0 }
  0x18   : > { %p1268_p2 = pnand %p904_p0, %p1228_p3  ;;  %s984_s8 = scalar_lea.hbm %s1593_s1, 128 }
  0x19   : > { %p985_p5 = scmp.ne.s32.totalorder %s1593_s1, %s984_s8  ;;  %p991_p1 = scmp.lt.u32.totalorder %s984_s8, %s1593_s1 }
  0x1a   : > { %p986_p6 = pneg %p1268_p2 }
  0x1c   : > { %p987_p10 = pnand %p986_p6, %p985_p5 }
  0x1e   : > { %p988_p11 = pneg %p987_p10 }
  0x20   : > { %p993_p0 = pnand %p991_p1, %p988_p11 }
  0x22   : > { %996 = shalt.err (!%p993_p0)
}
  0x23   : > { %s997_s19 = scalar_lea.vmem %s149_s28, 128  ;;  %p1005_p3 = scmp.lt.s32.totalorder %s149_s28, %s149_s28 }
  0x24   : > { %p998_p12 = scmp.ne.s32.totalorder %s149_s28, %s997_s19  ;;  %p1006_p7 = scmp.lt.s32.totalorder %s997_s19, %s997_s19 }
  0x26   : > { %p1000_p9 = pnand %p998_p12, %p986_p6  ;;  %p1007_p13 = por %p1006_p7, %p1005_p3 }
  0x28   : > { %p1001_p8 = pneg %p1000_p9 }
  0x2a   : > { %p1008_p4 = pnand %p1007_p13, %p1001_p8 }
  0x2c   : > { %1011 = shalt.err (!%p1008_p4)
}
  0x2d   : > { %907 = dma.hbm_to_vmem [thread:$0]  (!%p1268_p2), %s1593_s1, 128, %s149_s28, [#allocation9]  }
  0x2e   : > { %s1012_s7 = scalar_lea.hbm %s1594_s2, 512 }
  0x2f   : > { %p1013_p9 = scmp.ne.s32.totalorder %s1594_s2, %s1012_s7  ;;  %p1019_p8 = scmp.lt.u32.totalorder %s1012_s7, %s1594_s2 }
  0x31   : > { %p1015_p3 = pnand %p1013_p9, %p986_p6 }
  0x33   : > { %p1016_p7 = pneg %p1015_p3 }
  0x35   : > { %p1021_p12 = pnand %p1019_p8, %p1016_p7 }
  0x37   : > { %1024 = shalt.err (!%p1021_p12)
}
  0x38   : > { %s1025_s28 = scalar_lea.vmem %s1272_s4, 512  ;;  %p1033_p10 = scmp.lt.s32.totalorder %s1272_s4, %s1272_s4 }
  0x39   : > { %p1026_p13 = scmp.ne.s32.totalorder %s1272_s4, %s1025_s28  ;;  %p1034_p11 = scmp.lt.s32.totalorder %s1025_s28, %s1025_s28 }
  0x3b   : > { %p1028_p4 = pnand %p1026_p13, %p986_p6  ;;  %p1035_p1 = por %p1034_p11, %p1033_p10 }
  0x3d   : > { %p1029_p5 = pneg %p1028_p4 }
  0x3f   : > { %p1036_p0 = pnand %p1035_p1, %p1029_p5 }
  0x41   : > { %1039 = shalt.err (!%p1036_p0)
}
  0x42   : > { %s1160_s18 = smov 128   ;;  %s1161_s19 = smov 8  }
  0x43   : > { %910 = dma.hbm_to_vmem [thread:$0]  (!%p1268_p2), %s1594_s2, 512, %s1272_s4, [#allocation9], %s1160_s18, %s1160_s18, %s1161_s19  }
  0x44   : > { %s172_s30 = sand.u32 1, %s1144_s14   ;;  %s29_s6 = sadd.s32 1, %s1152_s16 }
  0x45   : > { %s828_s7 = sshll.u32 %s172_s30, 6  ;;  %p30_p6 = scmp.ge.s32.totalorder %s29_s6, 2 }
  0x46   : > { %s829_s8 = sshll.u32 %s1152_s16, 7  ;;  %s176_s9 = scalar_lea.vmem [#allocation5], %s828_s7 }
  0x47   : > { %s185_s10 = sshll.u32 %s176_s9, 4  ;;  %s1627_s6 = smov (%p30_p6, %s29_s6), 0  ;;  %s1334_s10 = int_to_ptr.vmem [resolvable:$true] %s185_s10 }
  0x48   : > { %s1332_s28 = scalar_lea.hbm %s1592_s0, %s829_s8  ;;  %s37_s4 = ssub.s32 %s1152_s16, %s1627_s6 }
  0x49   : > { %p1338_p2 = scmp.eq.s32.totalorder %s37_s4, 0  ;;  %s1342_s27 = scalar_lea.sflag [#allocation6], %s172_s30 }
  0x4a   : > { %s1040_s7 = scalar_lea.hbm %s1332_s28, 1024  ;;  %p1611_p3 = scmp.ne.s32.totalorder %s1608_s29, 0 }
  0x4b   : > { %p1041_p9 = scmp.ne.s32.totalorder %s1332_s28, %s1040_s7  ;;  %s1045_s11 = scalar_lea.hbm %s1592_s0, 2048 }
  0x4c   : > { %p1042_p7 = pneg %p1611_p3  ;;  %p1046_p13 = scmp.lt.u32.totalorder %s1332_s28, %s1592_s0 }
  0x4d   : > { %p1047_p4 = scmp.lt.u32.totalorder %s1045_s11, %s1040_s7  ;;  %p1049_p10 = scmp.lt.u32.totalorder %s1040_s7, %s1332_s28 }
  0x4e   : > { %p1043_p8 = pnand %p1042_p7, %p1041_p9 }
  0x4f   : > { %p1048_p5 = por %p1047_p4, %p1046_p13 }
  0x50   : > { %p1044_p12 = pneg %p1043_p8 }
  0x51   : > { %p1050_p11 = por %p1049_p10, %p1048_p5 }
  0x53   : > { %p1051_p1 = pnand %p1050_p11, %p1044_p12 }
  0x55   : > { %1054 = shalt.err (!%p1051_p1)
}
  0x56   : > { %s1055_s30 = scalar_lea.vmem %s1334_s10, 1024  ;;  %s1162_s4 = smov [#allocation5]  }
  0x57   : > { %p1056_p0 = scmp.ne.s32.totalorder %s1334_s10, %s1055_s30  ;;  %s1060_s8 = sshll.u32 %s1162_s4, 4  ;;  %s1061_s8 = int_to_ptr.vmem [resolvable:$false] %s1060_s8 }
  0x58   : > { %s1062_s20 = scalar_lea.vmem %s1061_s8, 2048  ;;  %p1063_p8 = scmp.lt.s32.totalorder %s1334_s10, %s1061_s8 }
  0x59   : > { %p1058_p6 = pnand %p1056_p0, %p1042_p7  ;;  %p1064_p13 = scmp.lt.s32.totalorder %s1062_s20, %s1055_s30 }
  0x5b   : > { %p1059_p9 = pneg %p1058_p6  ;;  %p1065_p4 = por %p1064_p13, %p1063_p8 }
  0x5d   : > { %p1066_p5 = pnand %p1065_p4, %p1059_p9 }
  0x5f   : > { %1069 = shalt.err (!%p1066_p5)
}
  0x60   : > { %s1163_s7 = smov 256   ;;  %s1612_s9 = sadd.s32 1, %s1144_s14 }
  0x61   : > { %914 = dma.hbm_to_vmem [thread:$0]  (!%p1611_p3), %s1332_s28, 1024, %s1334_s10, %s1342_s27, %s1163_s7, %s1160_s18, %s1161_s19  }
  0x62   : > { %s1377_s11 = scalar_select %p1338_p2, %s1144_s14, %s1612_s9  }
  0x63   : > { %p1613_p7 = scmp.ne.s32.totalorder %s1607_s26, 0 }
  0x64   : > { %s1382_s5 = sand.u32 (!%p1613_p7), 1, %s1140_s13   ;;  %p1614_p12 = scmp.ne.s32.totalorder (!%p1613_p7), %s1604_s23, 0 }
  0x65   : > { %197 = sbr.rel (%p1613_p7) target bundleno = 413 (0x19d), region = 32  ;;  %s831_s29 = sshll.u32 (!%p1613_p7), %s1382_s5, 6 }
  0x66   : > { %s200_s30 = scalar_lea.sflag (!%p1613_p7), [#allocation6], %s1382_s5  ;;  %s1386_s4 = scalar_lea.vmem (!%p1613_p7), [#allocation5], %s831_s29 }
  0x6c   : > { %1123 = dma.done.wait (%p1614_p12), %s200_s30, 1024  }
  0x6d   : > { %1125 = vsyncadd (%p1614_p12), %s200_s30, 4294966272  ;;  %p1615_p2 = scmp.ne.s32.totalorder %s1602_s21, 0 }
  0x6f   : > { %1127 = dma.done.wait (%p1615_p2), [#allocation9], 640  }
  0x70   : > { %1129 = vsyncadd (%p1615_p2), [#allocation9], 4294966656  ;;  %p236_p3 = scmp.eq.s32.totalorder %s1148_s15, 0  ;;  %s1397_s26 = scalar_lea.vmem [#allocation11], %s831_s29 }
  0x71   : > { %p835_p10 = scmp.ne.s32.totalorder %s1148_s15, 0 }
  0x72   : > { %vm240_vm0 = vcmask (!%p835_p10), 261120   ;;  %v1164_v0 = vmov (!%p835_p10), 0.0  }
  0x73   : > { %239 = sbr.rel (%p835_p10) target bundleno = 124 (0x7c), region = 48  ;;  %241 = vst.msk [vmem:[#allocation2] sm:$0xff] (!%p835_p10), %vm240_vm0, %v1164_v0  ;;  %242 = vst.msk [vmem:[#allocation3] sm:$0xff] (!%p835_p10), %vm240_vm0, %v1164_v0 }
  0x74   : > { %243 = vst.msk [vmem:[#allocation3 + $0x10] sm:$0xff] (!%p835_p10), %vm240_vm0, %v1164_v0  ;;  %244 = vst.msk [vmem:[#allocation3 + $0x20] sm:$0xff] (!%p835_p10), %vm240_vm0, %v1164_v0 }
  0x75   : > { %245 = vst.msk [vmem:[#allocation3 + $0x30] sm:$0xff] (!%p835_p10), %vm240_vm0, %v1164_v0  ;;  %246 = vst.msk [vmem:[#allocation3 + $0x40] sm:$0xff] (!%p835_p10), %vm240_vm0, %v1164_v0 }
  0x76   : > { %247 = vst.msk [vmem:[#allocation3 + $0x50] sm:$0xff] (!%p835_p10), %vm240_vm0, %v1164_v0  ;;  %248 = vst.msk [vmem:[#allocation3 + $0x60] sm:$0xff] (!%p835_p10), %vm240_vm0, %v1164_v0 }
  0x77   : > { %249 = vst.msk [vmem:[#allocation3 + $0x70] sm:$0xff] (!%p835_p10), %vm240_vm0, %v1164_v0  ;;  %250 = vst.msk [vmem:[#allocation4] sm:$0xff] (!%p835_p10), %vm240_vm0, %v1164_v0 }
  0x78   : > { %251 = vst.msk [vmem:[#allocation4 + $0x10] sm:$0xff] (!%p835_p10), %vm240_vm0, %v1164_v0  ;;  %252 = vst.msk [vmem:[#allocation4 + $0x20] sm:$0xff] (!%p835_p10), %vm240_vm0, %v1164_v0 }
  0x79   : > { %253 = vst.msk [vmem:[#allocation4 + $0x30] sm:$0xff] (!%p835_p10), %vm240_vm0, %v1164_v0  ;;  %254 = vst.msk [vmem:[#allocation4 + $0x40] sm:$0xff] (!%p835_p10), %vm240_vm0, %v1164_v0 }
  0x7a   : > { %255 = vst.msk [vmem:[#allocation4 + $0x50] sm:$0xff] %vm240_vm0, %v1164_v0  ;;  %256 = vst.msk [vmem:[#allocation4 + $0x60] sm:$0xff] %vm240_vm0, %v1164_v0 }
  0x7b   : > { %257 = vst.msk [vmem:[#allocation4 + $0x70] sm:$0xff] %vm240_vm0, %v1164_v0 }
  0x7c PF: > { %v569_v1 = vld [vmem:[#allocation10] sm:$0xff]  ;;  %v570_v2 = vld [vmem:[#allocation10 + $0x8] sm:$0xff]  ;;  %v571_v3 = vld [vmem:[#allocation10 + $0x10] sm:$0xff]  ;;  %vm267_vm1 = vcmask 261120   ;;  %v292_v4 = vlaneseq  ;;  %v1165_v46 = vmov 1966171168  }
  0x7d   : > { %v880_v5 = vpack.c.bf16 %v570_v2, %v569_v1  ;;  %v572_v6 = vld [vmem:[#allocation10 + $0x18] sm:$0xff]  ;;  %v260_v12 = vld [vmem:[%s1386_s4 + $0x8] sm:$0xff]  ;;  %v261_v14 = vld [vmem:[%s1386_s4 + $0x10] sm:$0xff]  ;;  %v422_v47 = vunpack.c.l.s4 %v1165_v46  ;;  %s1466_s21 = scalar_select %p236_p3, 1, 0  ;;  %vm565_vm3 = vcmask 261127  }
  0x7e   : > { %v259_v7 = vld [vmem:[%s1386_s4] sm:$0xff]  ;;  %v884_v8 = vpack.c.bf16 %v572_v6, %v571_v3  ;;  %v1421_v10 = vshrl.u32 %v292_v4, 7  ;;  %269 = vst.msk [vmem:[#allocation3 + $0x18] sm:$0xff] %vm267_vm1, %v260_v12  ;;  %v264_v13 = vld [vmem:[%s1386_s4 + $0x28] sm:$0xff]  ;;  %v265_v15 = vld [vmem:[%s1386_s4 + $0x30] sm:$0xff]  ;;  %vm546_vm4 = vcmask 1041409  }
  0x7f   : > { %v1418_v9 = vld [vmem:[#allocation8] sm:$0xff]  ;;  %268 = vst.msk [vmem:[#allocation3 + $0x8] sm:$0xff] %vm267_vm1, %v259_v7  ;;  %881 = vmatprep.subr.bf16.mxu0 %v880_v5  ;;  %888 = vmatprep.subr.bf16.mxu1 %v880_v5  ;;  %273 = vst.msk [vmem:[#allocation3 + $0x58] sm:$0xff] %vm267_vm1, %v264_v13  ;;  %v262_v17 = vld [vmem:[%s1386_s4 + $0x18] sm:$0xff]  ;;  %v423_v55 = vunpack.c.0.s8 %v422_v47  ;;  %vm549_vm5 = vcmask 1042434   ;;  %vm552_vm6 = vcmask 1043459  }
  0x80   : > { %v263_v11 = vld [vmem:[%s1386_s4 + $0x20] sm:$0xff]  ;;  %883 = vmatpush3.bf16.msra.mxu0 %v880_v5  ;;  %890 = vmatpush3.bf16.msra.mxu1 %v880_v5  ;;  %v1431_v16 = vsub.s32 0, %v1421_v10  ;;  %270 = vst.msk [vmem:[#allocation3 + $0x28] sm:$0xff] %vm267_vm1, %v261_v14  ;;  %274 = vst.msk [vmem:[#allocation3 + $0x68] sm:$0xff] %vm267_vm1, %v265_v15  ;;  %v266_v18 = vld [vmem:[%s1386_s4 + $0x38] sm:$0xff]  ;;  %v320_v38 = vmul.f32 %v1418_v9, %v1418_v9  ;;  %vm555_vm7 = vcmask 1044484  }
  0x81   : > { %272 = vst.msk [vmem:[#allocation3 + $0x48] sm:$0xff] %vm267_vm1, %v263_v11  ;;  %885 = vmatprep.subr.bf16.mxu0 %v884_v8  ;;  %889 = vmatprep.subr.bf16.mxu1 %v884_v8  ;;  %271 = vst.msk [vmem:[#allocation3 + $0x38] sm:$0xff] %vm267_vm1, %v262_v17  ;;  %v418_v60 = vld [vmem:[#allocation2] sm:$0xff]  ;;  %v426_v3 = vsub.s32 %v423_v55, %v1421_v10  ;;  %vm558_vm8 = vcmask 1045509   ;;  %vm561_vm9 = vcmask 1046534   ;;  %vm567_vm10 = vcmask 260096  }
  0x82   : > { %275 = vst.msk [vmem:[#allocation3 + $0x78] sm:$0xff] %vm267_vm1, %v266_v18  ;;  %v295_v19 = vrot.slane %v1418_v9, %v1431_v16  ;;  %v340_v52 = vrot.slane %v320_v38, %v1431_v16  ;;  %v420_v7 = vcombine.high %v418_v60, %v418_v60  ;;  %v365_v14 = vmul.f32 %v320_v38, %v320_v38  ;;  %s845_s23 = sshll.u32 %s1148_s15, 7  ;;  %s718_s18 = sshll.u32 %s1397_s26, 4  ;;  %s1537_s18 = int_to_ptr.vmem [resolvable:$true] %s718_s18 }
  0x83   : > { %s1533_s28 = scalar_lea.hbm %s1595_s3, %s845_s23  ;;  %s703_s15 = scalar_lea.sflag [#allocation7], %s1382_s5 }
  0x84   : > { %887 = vmatpush3.bf16.msra.mxu0 %v884_v8  ;;  %891 = vmatpush3.bf16.msra.mxu1 %v884_v8  ;;  %s1070_s22 = scalar_lea.vmem %s1537_s18, 1024  ;;  %p1618_p1 = scmp.ne.s32.totalorder %s1605_s24, 0 }
  0x85   : > { %v277_v26 = vld [vmem:[#allocation3 + $0x18] sm:$0xff]  ;;  %p1071_p11 = scmp.ne.s32.totalorder %s1537_s18, %s1070_s22  ;;  %s1166_s27 = smov [#allocation11]  }
  0x86   : > { %v276_v20 = vld [vmem:[#allocation3 + $0x8] sm:$0xff]  ;;  %v285_v27 = vld [vmem:[#allocation3 + $0x17] sm:$0xff]  ;;  %s1074_s8 = sshll.u32 %s1166_s27, 4  ;;  %s1075_s8 = int_to_ptr.vmem [resolvable:$false] %s1074_s8 }
  0x87   : > { %v284_v21 = vld [vmem:[#allocation3 + $0x7] sm:$0xff]  ;;  %v289_v28 = vld [vmem:[#allocation3 + $0x57] sm:$0xff]  ;;  %v297_v30 = vmul.f32 %v295_v19, %v285_v27  ;;  %p1072_p0 = pnand %p1071_p11, %p1618_p1  ;;  %s1076_s20 = scalar_lea.vmem %s1075_s8, 2048 }
  0x88   : > { %v296_v22 = vmul.f32 %v295_v19, %v284_v21  ;;  %v280_v23 = vld [vmem:[#allocation3 + $0x48] sm:$0xff]  ;;  %v281_v31 = vld [vmem:[#allocation3 + $0x58] sm:$0xff]  ;;  %v301_v34 = vmul.f32 %v295_v19, %v289_v28  ;;  %p1077_p9 = scmp.lt.s32.totalorder %s1537_s18, %s1075_s8  ;;  %p1078_p8 = scmp.lt.s32.totalorder %s1076_s20, %s1070_s22 }
  0x89   : > { %v288_v24 = vld [vmem:[#allocation3 + $0x47] sm:$0xff]  ;;  %v287_v37 = vld [vmem:[#allocation3 + $0x37] sm:$0xff]  ;;  %v305_v39 = vadd.f32 %v297_v30, %v277_v26  ;;  %v434_v26 = vrot.slane %v420_v7, %v426_v3  ;;  %v385_v30 = vrot.slane %v365_v14, %v1431_v16  ;;  %p1073_p6 = pneg %p1072_p0 }
  0x8a   : > { %v300_v25 = vmul.f32 %v295_v19, %v288_v24  ;;  %v304_v29 = vadd.f32 %v296_v22, %v276_v20  ;;  %v286_v32 = vld [vmem:[#allocation3 + $0x27] sm:$0xff]  ;;  %v309_v42 = vadd.f32 %v301_v34, %v281_v31  ;;  %v279_v44 = vld [vmem:[#allocation3 + $0x38] sm:$0xff]  ;;  %v299_v49 = vmul.f32 %v295_v19, %v287_v37  ;;  %p1079_p13 = por %p1078_p8, %p1077_p9 }
  0x8b   : > { %v278_v35 = vld [vmem:[#allocation3 + $0x28] sm:$0xff]  ;;  %v298_v40 = vmul.f32 %v295_v19, %v286_v32  ;;  %v291_v45 = vld [vmem:[#allocation3 + $0x77] sm:$0xff]  ;;  %313 = vst.msk [vmem:[#allocation4 + $0x18] sm:$0xff] %vm267_vm1, %v305_v39  ;;  %v436_v38 = vcombine.high %v434_v26, %v434_v26 }
  0x8c   : > { %v308_v33 = vadd.f32 %v300_v25, %v280_v23  ;;  %v290_v36 = vld [vmem:[#allocation3 + $0x67] sm:$0xff]  ;;  %312 = vst.msk [vmem:[#allocation4 + $0x8] sm:$0xff] %vm267_vm1, %v304_v29  ;;  %317 = vst.msk [vmem:[#allocation4 + $0x58] sm:$0xff] %vm267_vm1, %v309_v42  ;;  %v283_v51 = vld [vmem:[#allocation3 + $0x78] sm:$0xff]  ;;  %v307_v53 = vadd.f32 %v299_v49, %v279_v44  ;;  %v303_v54 = vmul.f32 %v295_v19, %v291_v45  ;;  %p1080_p4 = pnand %p1079_p13, %p1073_p6 }
  0x8d   : > { %v282_v41 = vld [vmem:[#allocation3 + $0x68] sm:$0xff]  ;;  %v302_v43 = vmul.f32 %v295_v19, %v290_v36  ;;  %v306_v48 = vadd.f32 %v298_v40, %v278_v35  ;;  %v427_v23 = vrot.slane %v418_v60, %v426_v3 }
  0x8e   : > { %316 = vst.msk [vmem:[#allocation4 + $0x48] sm:$0xff] %vm267_vm1, %v308_v33  ;;  %315 = vst.msk [vmem:[#allocation4 + $0x38] sm:$0xff] %vm267_vm1, %v307_v53  ;;  %v311_v56 = vadd.f32 %v303_v54, %v283_v51  ;;  %v464_v54 = vrot.slane %v436_v38, %v426_v3 }
  0x8f   : > { %v310_v50 = vadd.f32 %v302_v43, %v282_v41  ;;  %314 = vst.msk [vmem:[#allocation4 + $0x28] sm:$0xff] %vm267_vm1, %v306_v48  ;;  %v435_v33 = vcombine.high %v427_v23, %v427_v23  ;;  %v443_v37 = vrot.slane %v427_v23, %v426_v3  ;;  %v450_v43 = vrot.slane %v434_v26, %v426_v3 }
  0x90   : > { %319 = vst.msk [vmem:[#allocation4 + $0x78] sm:$0xff] %vm267_vm1, %v311_v56 }
  0x91   : > { %318 = vst.msk [vmem:[#allocation4 + $0x68] sm:$0xff] %vm267_vm1, %v310_v50  ;;  %v457_v48 = vrot.slane %v435_v33, %v426_v3  ;;  %v472_v51 = vrot.slane %v443_v37, %v1431_v16 }
  0x92   : > { %v322_v0 = vld [vmem:[#allocation4 + $0x18] sm:$0xff] }
  0x93   : > { %v321_v57 = vld [vmem:[#allocation4 + $0x8] sm:$0xff]  ;;  %v330_v1 = vld [vmem:[#allocation4 + $0x16] sm:$0xff]  ;;  %v476_v3 = vrot.slane %v457_v48, %v1431_v16  ;;  %v467_v7 = vcombine.high %v457_v48, %v457_v48 }
  0x94   : > { %v329_v58 = vld [vmem:[#allocation4 + $0x6] sm:$0xff]  ;;  %v342_v4 = vmul.f32 %v340_v52, %v330_v1  ;;  %v326_v5 = vld [vmem:[#allocation4 + $0x58] sm:$0xff] }
  0x95   : > { %v341_v59 = vmul.f32 %v340_v52, %v329_v58  ;;  %v325_v61 = vld [vmem:[#allocation4 + $0x48] sm:$0xff]  ;;  %v334_v6 = vld [vmem:[#allocation4 + $0x56] sm:$0xff]  ;;  %v484_v23 = vrot.slane %v467_v7, %v1431_v16 }
  0x96   : > { %v333_v62 = vld [vmem:[#allocation4 + $0x46] sm:$0xff]  ;;  %v346_v11 = vmul.f32 %v340_v52, %v334_v6  ;;  %v350_v15 = vadd.f32 %v342_v4, %v322_v0  ;;  %v324_v10 = vld [vmem:[#allocation4 + $0x38] sm:$0xff] }
  0x97   : > { %v345_v63 = vmul.f32 %v340_v52, %v333_v62  ;;  %v349_v2 = vadd.f32 %v341_v59, %v321_v57  ;;  %v323_v12 = vld [vmem:[#allocation4 + $0x28] sm:$0xff]  ;;  %v332_v22 = vld [vmem:[#allocation4 + $0x36] sm:$0xff]  ;;  %v465_v57 = vcombine.high %v443_v37, %v443_v37  ;;  %v466_v62 = vcombine.high %v450_v43, %v450_v43 }
  0x98   : > { %v331_v13 = vld [vmem:[#allocation4 + $0x26] sm:$0xff]  ;;  %v354_v20 = vadd.f32 %v346_v11, %v326_v5  ;;  %358 = vst.msk [vmem:[#allocation3 + $0x18] sm:$0xff] %vm267_vm1, %v350_v15  ;;  %v344_v25 = vmul.f32 %v340_v52, %v332_v22  ;;  %v328_v28 = vld [vmem:[#allocation4 + $0x78] sm:$0xff]  ;;  %v526_v11 = vstv %s1466_s21  ;;  %v510_v22 = vmul.f32 %v476_v3, %v1418_v9 }
  0x99   : > { %v353_v8 = vadd.f32 %v345_v63, %v325_v61  ;;  %357 = vst.msk [vmem:[#allocation3 + $0x8] sm:$0xff] %vm267_vm1, %v349_v2  ;;  %v343_v17 = vmul.f32 %v340_v52, %v331_v13  ;;  %v327_v18 = vld [vmem:[#allocation4 + $0x68] sm:$0xff]  ;;  %v336_v29 = vld [vmem:[#allocation4 + $0x76] sm:$0xff]  ;;  %v488_v63 = vrot.slane %v450_v43, %v1431_v16  ;;  %vm1485_vm2 = vcmp.eq.s32.totalorder %v526_v11, 1 }
  0x9a   : > { %v335_v19 = vld [vmem:[#allocation4 + $0x66] sm:$0xff]  ;;  %362 = vst.msk [vmem:[#allocation3 + $0x58] sm:$0xff] %vm267_vm1, %v354_v20  ;;  %v352_v31 = vadd.f32 %v344_v25, %v324_v10  ;;  %v348_v32 = vmul.f32 %v340_v52, %v336_v29  ;;  %v468_v20 = vcombine.high %v464_v54, %v464_v54  ;;  %v496_v10 = vrot.slane %v466_v62, %v1431_v16 }
  0x9b   : > { %361 = vst.msk [vmem:[#allocation3 + $0x48] sm:$0xff] %vm267_vm1, %v353_v8  ;;  %v347_v21 = vmul.f32 %v340_v52, %v335_v19  ;;  %v351_v24 = vadd.f32 %v343_v17, %v323_v12  ;;  %v509_v8 = vmul.f32 %v472_v51, %v1418_v9  ;;  %v492_v12 = vrot.slane %v464_v54, %v1431_v16 }
  0x9c   : > { %360 = vst.msk [vmem:[#allocation3 + $0x38] sm:$0xff] %vm267_vm1, %v352_v31  ;;  %v356_v34 = vadd.f32 %v348_v32, %v328_v28  ;;  %v480_v17 = vrot.slane %v465_v57, %v1431_v16  ;;  %v500_v31 = vrot.slane %v468_v20, %v1431_v16  ;;  %v512_v38 = vmul.f32 %v484_v23, %v1418_v9 }
  0x9d   : > { %v355_v27 = vadd.f32 %v347_v21, %v327_v18  ;;  %359 = vst.msk [vmem:[#allocation3 + $0x28] sm:$0xff] %vm267_vm1, %v351_v24  ;;  %v513_v21 = vmul.f32 %v488_v63, %v1418_v9 }
  0x9e   : > { %364 = vst.msk [vmem:[#allocation3 + $0x78] sm:$0xff] %vm267_vm1, %v356_v34  ;;  %v515_v34 = vmul.f32 %v496_v10, %v1418_v9 }
  0x9f   : > { %363 = vst.msk [vmem:[#allocation3 + $0x68] sm:$0xff] %vm267_vm1, %v355_v27  ;;  %v367_v44 = vld [vmem:[#allocation3 + $0x18] sm:$0xff]  ;;  %v514_v27 = vmul.f32 %v492_v12, %v1418_v9 }
  0xa0   : > { %v366_v35 = vld [vmem:[#allocation3 + $0x8] sm:$0xff]  ;;  %v375_v45 = vld [vmem:[#allocation3 + $0x14] sm:$0xff] }
  0xa1   : > { %v374_v36 = vld [vmem:[#allocation3 + $0x4] sm:$0xff]  ;;  %v387_v47 = vmul.f32 %v385_v30, %v375_v45  ;;  %v371_v49 = vld [vmem:[#allocation3 + $0x58] sm:$0xff] }
  0xa2   : > { %v386_v39 = vmul.f32 %v385_v30, %v374_v36  ;;  %v370_v40 = vld [vmem:[#allocation3 + $0x48] sm:$0xff]  ;;  %v379_v50 = vld [vmem:[#allocation3 + $0x54] sm:$0xff] }
  0xa3   : > { %v378_v41 = vld [vmem:[#allocation3 + $0x44] sm:$0xff]  ;;  %v391_v53 = vmul.f32 %v385_v30, %v379_v50  ;;  %v395_v58 = vadd.f32 %v387_v47, %v367_v44  ;;  %v369_v2 = vld [vmem:[#allocation3 + $0x38] sm:$0xff]  ;;  %v516_v44 = vmul.f32 %v500_v31, %v1418_v9 }
  0xa4   : > { %v390_v42 = vmul.f32 %v385_v30, %v378_v41  ;;  %v394_v46 = vadd.f32 %v386_v39, %v366_v35  ;;  %v368_v55 = vld [vmem:[#allocation3 + $0x28] sm:$0xff]  ;;  %v377_v4 = vld [vmem:[#allocation3 + $0x34] sm:$0xff] }
  0xa5   : > { %v376_v56 = vld [vmem:[#allocation3 + $0x24] sm:$0xff]  ;;  %v399_v0 = vadd.f32 %v391_v53, %v371_v49  ;;  %403 = vst.msk [vmem:[#allocation4 + $0x18] sm:$0xff] %vm267_vm1, %v395_v58  ;;  %v389_v6 = vmul.f32 %v385_v30, %v377_v4  ;;  %v373_v14 = vld [vmem:[#allocation3 + $0x78] sm:$0xff] }
  0xa6   : > { %v398_v52 = vadd.f32 %v390_v42, %v370_v40  ;;  %402 = vst.msk [vmem:[#allocation4 + $0x8] sm:$0xff] %vm267_vm1, %v394_v46  ;;  %v388_v59 = vmul.f32 %v385_v30, %v376_v56  ;;  %v372_v60 = vld [vmem:[#allocation3 + $0x68] sm:$0xff]  ;;  %v381_v15 = vld [vmem:[#allocation3 + $0x74] sm:$0xff] }
  0xa7   : > { %v380_v61 = vld [vmem:[#allocation3 + $0x64] sm:$0xff]  ;;  %407 = vst.msk [vmem:[#allocation4 + $0x58] sm:$0xff] %vm267_vm1, %v399_v0  ;;  %v397_v18 = vadd.f32 %v389_v6, %v369_v2  ;;  %v393_v19 = vmul.f32 %v385_v30, %v381_v15 }
  0xa8   : > { %406 = vst.msk [vmem:[#allocation4 + $0x48] sm:$0xff] %vm267_vm1, %v398_v52  ;;  %v392_v1 = vmul.f32 %v385_v30, %v380_v61  ;;  %v396_v5 = vadd.f32 %v388_v59, %v368_v55  ;;  %v511_v30 = vmul.f32 %v480_v17, %v1418_v9 }
  0xa9   : > { %405 = vst.msk [vmem:[#allocation4 + $0x38] sm:$0xff] %vm267_vm1, %v397_v18  ;;  %v401_v24 = vadd.f32 %v393_v19, %v373_v14 }
  0xaa   : > { %v400_v13 = vadd.f32 %v392_v1, %v372_v60  ;;  %404 = vst.msk [vmem:[#allocation4 + $0x28] sm:$0xff] %vm267_vm1, %v396_v5 }
  0xab   : > { %409 = vst.msk [vmem:[#allocation4 + $0x78] sm:$0xff] %vm267_vm1, %v401_v24 }
  0xac   : > { %408 = vst.msk [vmem:[#allocation4 + $0x68] sm:$0xff] %vm267_vm1, %v400_v13  ;;  %v411_v33 = vld [vmem:[#allocation4 + $0x18] sm:$0xff] }
  0xad   : > { %v410_v25 = vld [vmem:[#allocation4 + $0x8] sm:$0xff]  ;;  %v518_v36 = vadd.f32 %v510_v22, %v411_v33 }
  0xae   : > { %v517_v28 = vadd.f32 %v509_v8, %v410_v25  ;;  %v415_v37 = vld [vmem:[#allocation4 + $0x58] sm:$0xff] }
  0xaf   : > { %v414_v29 = vld [vmem:[#allocation4 + $0x48] sm:$0xff]  ;;  %v522_v40 = vadd.f32 %v514_v27, %v415_v37  ;;  %v529_v16 = vsel %vm1485_vm2, %v411_v33, %v518_v36 }
  0xb0   : > { %v521_v32 = vadd.f32 %v513_v21, %v414_v29  ;;  %v528_v35 = vsel %vm1485_vm2, %v410_v25, %v517_v28  ;;  %v544_v45 = vrot.slane %v529_v16, 7  ;;  %v413_v48 = vld [vmem:[#allocation4 + $0x38] sm:$0xff] }
  0xb1   : > { %566 = vst.msk [vmem:[#allocation2 - $0x7] sm:$0x80] %vm565_vm3, %v528_v35  ;;  %868 = vmatprep.mubr.msk.f32.mxu0 %vm267_vm1, %v528_v35  ;;  %v412_v41 = vld [vmem:[#allocation4 + $0x28] sm:$0xff]  ;;  %v533_v46 = vsel %vm1485_vm2, %v415_v37, %v522_v40  ;;  %v520_v50 = vadd.f32 %v512_v38, %v413_v48 }
  0xb2   : > { %v532_v39 = vsel %vm1485_vm2, %v414_v29, %v521_v32  ;;  %v519_v42 = vadd.f32 %v511_v30, %v412_v41  ;;  %869 = vmatmul.mubr.msk.f32.vlgmr.msra.gmra.mrb[0].mxu0 %vm267_vm1, %v529_v16  ;;  %v417_v52 = vld [vmem:[#allocation4 + $0x78] sm:$0xff]  ;;  %v554_v56 = vrot.slane %v533_v46, 3 }
  0xb3   : > { %874 = vmatprep.mubr.msk.f32.mxu1 %vm267_vm1, %v532_v39  ;;  %v416_v43 = vld [vmem:[#allocation4 + $0x68] sm:$0xff]  ;;  %v551_v53 = vrot.slane %v532_v39, 4  ;;  %v531_v54 = vsel %vm1485_vm2, %v413_v48, %v520_v50  ;;  %v524_v55 = vadd.f32 %v516_v44, %v417_v52 }
  0xb4   : > { %v523_v47 = vadd.f32 %v515_v34, %v416_v43  ;;  %875 = vmatmul.mubr.msk.f32.vlgmr.msra.gmra.mrb[0].mxu1 %vm267_vm1, %v533_v46  ;;  %v530_v49 = vsel %vm1485_vm2, %v412_v41, %v519_v42  ;;  %v548_v58 = vrot.slane %v531_v54, 5 }
  0xb5   : > { %v545_v51 = vrot.slane %v530_v49, 6  ;;  %871 = vmatprep.mubr.msk.f32.mxu0 %vm267_vm1, %v530_v49  ;;  %v535_v60 = vsel %vm1485_vm2, %v417_v52, %v524_v55 }
  0xb6   : > { %v534_v9 = vsel %vm1485_vm2, %v416_v43, %v523_v47  ;;  %872 = vmatmul.mubr.msk.f32.gmra.mrb[2].mxu0 %vm267_vm1, %v531_v54  ;;  %v560_v62 = vrot.slane %v535_v60, 1 }
  0xb7   : > { %877 = vmatprep.mubr.msk.f32.mxu1 %vm267_vm1, %v534_v9  ;;  %v547_v57 = vsel %vm546_vm4, %v545_v51, %v544_v45  ;;  %v557_v59 = vrot.slane %v534_v9, 2 }
  0xb8   : > { %v550_v61 = vsel %vm549_vm5, %v548_v58, %v547_v57  ;;  %878 = vmatmul.mubr.msk.f32.gmra.mrb[2].mxu1 %vm267_vm1, %v535_v60 }
  0xb9   : > { %v553_v63 = vsel %vm552_vm6, %v551_v53, %v550_v61 }
  0xba   : > { %v556_v0 = vsel %vm555_vm7, %v554_v56, %v553_v63 }
  0xbb   : > { %v559_v1 = vsel %vm558_vm8, %v557_v59, %v556_v0 }
  0xbc   : > { %v562_v2 = vsel %vm561_vm9, %v560_v62, %v559_v1 }
  0xbd   : > { %568 = vst.msk [vmem:[#allocation2 + $0x1] sm:$0x7f] %vm567_vm10, %v562_v2 }
 0x185   : > { %v870_v4 = vpop.f32.mrb[0].mxu0 }
 0x186   : > { %695 = vst.msk [vmem:[%s1397_s26 + $0x8] sm:$0xff] %vm267_vm1, %v870_v4  ;;  %v655_v5 = vpop.f32.mrb[1].mxu0 }
 0x187   : > { %v876_v3 = vpop.f32.mrb[0].mxu1  ;;  %694 = vst.msk [vmem:[%s1397_s26] sm:$0xff] %vm267_vm1, %v655_v5 }
 0x188   : > { %699 = vst.msk [vmem:[%s1397_s26 + $0x28] sm:$0xff] %vm267_vm1, %v876_v3  ;;  %v675_v6 = vpop.f32.mrb[1].mxu1 }
 0x189   : > { %698 = vst.msk [vmem:[%s1397_s26 + $0x20] sm:$0xff] %vm267_vm1, %v675_v6  ;;  %v873_v7 = vpop.f32.mrb[2].mxu0 }
 0x18a   : > { %697 = vst.msk [vmem:[%s1397_s26 + $0x18] sm:$0xff] %vm267_vm1, %v873_v7  ;;  %v665_v8 = vpop.f32.mrb[3].mxu0 }
 0x18b   : > { %v879_v11 = vpop.f32.mrb[2].mxu1  ;;  %696 = vst.msk [vmem:[%s1397_s26 + $0x10] sm:$0xff] %vm267_vm1, %v665_v8 }
 0x18c   : > { %701 = vst.msk [vmem:[%s1397_s26 + $0x38] sm:$0xff] %vm267_vm1, %v879_v11  ;;  %v685_v12 = vpop.f32.mrb[3].mxu1 }
 0x18d   : > { %700 = vst.msk [vmem:[%s1397_s26 + $0x30] sm:$0xff] %vm267_vm1, %v685_v12 }
 0x18e   : > { %1083 = shalt.err (!%p1080_p4)
}
 0x18f   : > { %s1084_s7 = scalar_lea.hbm %s1533_s28, 1024  ;;  %s1088_s30 = scalar_lea.hbm %s1595_s3, 2048 }
 0x190   : > { %p1085_p5 = scmp.ne.s32.totalorder %s1533_s28, %s1084_s7  ;;  %p1089_p2 = scmp.lt.u32.totalorder %s1533_s28, %s1595_s3 }
 0x191   : > { %p1090_p3 = scmp.lt.u32.totalorder %s1088_s30, %s1084_s7  ;;  %p1092_p11 = scmp.lt.u32.totalorder %s1084_s7, %s1533_s28 }
 0x192   : > { %p1086_p7 = pnand %p1085_p5, %p1618_p1 }
 0x193   : > { %p1091_p10 = por %p1090_p3, %p1089_p2 }
 0x194   : > { %p1087_p12 = pneg %p1086_p7 }
 0x195   : > { %p1093_p0 = por %p1092_p11, %p1091_p10 }
 0x197   : > { %p1094_p6 = pnand %p1093_p0, %p1087_p12 }
 0x199   : > { %1097 = shalt.err (!%p1094_p6)
}
 0x19a   : > { %s1167_s21 = smov 128   ;;  %s1168_s23 = smov 256  }
 0x19b   : > { %s1169_s19 = smov 8  }
 0x19c   : > { %902 = dma.vmem_to_hbm [thread:$0]  (%p1618_p1), %s1537_s18, 1024, %s1533_s28, %s703_s15, %s1167_s21, %s1168_s23, %s1169_s19  }
 0x19d PF: > { %s733_s10 = sand.u32 1, %s1136_s12   ;;  %p1619_p9 = scmp.ne.s32.totalorder %s1606_s25, 0 }
 0x19e   : > { %p1620_p8 = scmp.ge.s32.totalorder %s1156_s17, 2  ;;  %s734_s22 = scalar_lea.sflag [#allocation7], %s733_s10 }
 0x1a0   : > { %p916_p13 = pnand %p1620_p8, %p1619_p9 }
 0x1a2   : > { %1131 = dma.done.wait (!%p916_p13), %s734_s22, 1024  }
 0x1a3   : > { %1133 = vsyncadd (!%p916_p13), %s734_s22, 4294966272  ;;  %s20_s17 = sadd.s32 1, %s1156_s17   ;;  %s1621_s12 = smov %s1140_s13 }
 0x1a4   : > { %p17_p4 = scmp.ge.s32.totalorder %s20_s17, 4   ;;  %s1622_s13 = smov %s1144_s14 }
 0x1a5   : > { %s1623_s14 = smov %s1377_s11  ;;  %s1624_s15 = smov %s1152_s16 }
 0x1a6   : > { %s1625_s16 = smov %s1627_s6  ;;  %19 = sbr.rel (!%p17_p4) target bundleno = 7 (0x7), region = 89 }
 0x1ad   :  { %739 = vsyncpa [#allocation6], 1 }
 0x1ae   :  { %741 = vsyncpa [#allocation6 + $0x1], 1 }
 0x1af   :  { %742 = vsyncpa [#allocation9], 1 }
 0x1b0   :  { %743 = vsyncpa [#allocation7], 1 }
 0x1b1   :  { %745 = vsyncpa [#allocation7 + $0x1], 1 }

</bundles_post_ra>
